<compile_context>
chip_gen: v7x
topology: tpu7x:2x2x1
jax: 0.10.0
libtpu: 0.0.40
codegen_flags: <defaults>
</compile_context>

<pallas_src>
import functools

import jax
import jax.numpy as jnp
from jax.experimental import pallas as pl
from jax.experimental.pallas import tpu as pltpu

_LANE = 128
_MIN_ROW_TILE = 256


def _round_up(x, m):
    return ((x + m - 1) // m) * m


@functools.lru_cache(maxsize=1)
def _chip_profile():
    """Return (target_tile_bytes, vmem_soft_cap_bytes) for the local TPU generation."""
    vmem_cap = 128 * 1024 * 1024
    kind = ""
    try:
        vmem_cap = int(pltpu.get_tpu_info().vmem_capacity_bytes)
    except Exception:
        pass
    try:
        kind = jax.devices()[0].device_kind.lower()
    except Exception:
        pass
    if vmem_cap <= 64 * 1024 * 1024:
        # v7x-class: 64 MiB VMEM / TC, ~3.2 TB/s per-TC HBM -> bigger tiles to
        # amortize the ~0.35 us/step overhead, limit well under the 64 MiB budget.
        return 4 * 1024 * 1024, 40 * 1024 * 1024
    if "v5" in kind:
        # v5e: ~820 GB/s HBM; ~2 MiB tiles already amortize per-step overhead.
        return 2 * 1024 * 1024, 48 * 1024 * 1024
    # v6e (default): 128 MiB VMEM, ~1.4 TB/s per-TC HBM.
    return 4 * 1024 * 1024, 64 * 1024 * 1024


def _vmem_limit_bytes(tile_elems, itemsize, soft_cap):
    io = 2 * 2 * tile_elems * itemsize          # double-buffered input + output tiles
    scratch = 3 * tile_elems * 4                # f32 intermediates (x, xc, y)
    need = io + scratch + (2 << 20)             # + headroom for internal scratch
    return int(min(max(need, 16 << 20), soft_cap))


# --------------------------- channels_last path ----------------------------

def _ln_last_kernel(x_ref, w_ref, b_ref, o_ref, *, eps):
    # x_ref: (TM, C) tile; w_ref / b_ref: (1, C).
    x = x_ref[...].astype(jnp.float32)
    mean = jnp.mean(x, axis=-1, keepdims=True)
    xc = x - mean
    var = jnp.mean(xc * xc, axis=-1, keepdims=True)    # biased variance (F.layer_norm)
    inv = jax.lax.rsqrt(var + eps)                     # EUP slot; free in HBM-bound regime
    if o_ref.dtype == jnp.bfloat16:
        # bf16 affine epilogue: accumulation stays f32; stores halve HBM traffic and
        # the VALU runs 2x bf16/slot on v6e/v7x.
        xn = (xc * inv).astype(jnp.bfloat16)
        o_ref[...] = xn * w_ref[...].astype(jnp.bfloat16) + b_ref[...].astype(jnp.bfloat16)
    else:
        y = xc * inv * w_ref[...].astype(jnp.float32) + b_ref[...].astype(jnp.float32)
        o_ref[...] = y.astype(o_ref.dtype)


def _layernorm_channels_last(x2d, weight, bias, eps):
    """Row-wise LayerNorm over the last axis of a (R, C) array."""
    R, C = x2d.shape
    itemsize = x2d.dtype.itemsize
    target_bytes, soft_cap = _chip_profile()

    # Row tile near the generation-specific byte target, multiple of 256 rows.
    row_bytes = max(1, C * itemsize)
    tm = max(_MIN_ROW_TILE, (target_bytes // row_bytes // _MIN_ROW_TILE) * _MIN_ROW_TILE)
    tm = min(tm, 16384)
    # Never collapse to <2 steps for mid-size tensors (v7x megacore has 2 TCs and
    # shards "parallel" axes) and keep >= ~4 steps for large tensors so the
    # BlockSpec pipeline overlaps in-DMA / compute / out-DMA.  This also prevents
    # a nearly-all-padding ragged last block.
    if R >= 2 * _MIN_ROW_TILE:
        tm = min(tm, max(_MIN_ROW_TILE, _round_up(pl.cdiv(R, 4), _MIN_ROW_TILE)))
    if tm >= R:
        tm = R  # single block; full-extent block_shape is always legal

    grid = (pl.cdiv(R, tm),)
    w2 = weight.reshape(1, C).astype(jnp.float32)
    b2 = bias.reshape(1, C).astype(jnp.float32)

    # TODO(synk): ConvNeXt C=96/192 leaves the output last dim below a 128 multiple
    # (masked vst.msk stores, ~25% lane waste); if profiling shows the kernel is
    # store-bound, fold 4 rows into a lane-dense (R//4, 4*C) slab with segmented
    # lane reductions.  Skipped here: modest gain while HBM-bound.
    return pl.pallas_call(
        functools.partial(_ln_last_kernel, eps=eps),
        out_shape=jax.ShapeDtypeStruct((R, C), x2d.dtype),
        grid_spec=pltpu.PrefetchScalarGridSpec(
            num_scalar_prefetch=0,
            grid=grid,
            in_specs=[
                pl.BlockSpec((tm, C), lambda i: (i, 0)),
                pl.BlockSpec((1, C), lambda i: (0, 0)),
                pl.BlockSpec((1, C), lambda i: (0, 0)),
            ],
            out_specs=pl.BlockSpec((tm, C), lambda i: (i, 0)),
        ),
        compiler_params=pltpu.CompilerParams(
            dimension_semantics=("parallel",),
            vmem_limit_bytes=_vmem_limit_bytes(tm * C, itemsize, soft_cap),
        ),
    )(x2d, w2, b2)


# --------------------------- channels_first path ---------------------------

def _ln_first_kernel(x_ref, w_ref, b_ref, o_ref, *, eps):
    # x_ref: (1, C, THW) tile; reduce over the channel (sublane) axis.
    # w_ref / b_ref: (1, C, 1) -> broadcast over the spatial lane axis.
    x = x_ref[...].astype(jnp.float32)
    mean = jnp.mean(x, axis=1, keepdims=True)
    xc = x - mean
    var = jnp.mean(xc * xc, axis=1, keepdims=True)
    inv = jax.lax.rsqrt(var + eps)
    if o_ref.dtype == jnp.bfloat16:
        xn = (xc * inv).astype(jnp.bfloat16)
        o_ref[...] = xn * w_ref[...].astype(jnp.bfloat16) + b_ref[...].astype(jnp.bfloat16)
    else:
        y = xc * inv * w_ref[...].astype(jnp.float32) + b_ref[...].astype(jnp.float32)
        o_ref[...] = y.astype(o_ref.dtype)


def _layernorm_channels_first(x, weight, bias, eps):
    """LayerNorm over axis 1 of an NCHW tensor, without any transpose passes."""
    B, C, H, W = x.shape
    HW = H * W
    x3 = x.reshape(B, C, HW)                 # (B, C, HW): HW on lanes, C on sublanes
    itemsize = x3.dtype.itemsize
    target_bytes, soft_cap = _chip_profile()

    # Spatial tile near the byte target, multiple of 128 lanes (or full HW extent).
    col_bytes = max(1, C * itemsize)
    thw = max(_LANE, (target_bytes // col_bytes // _LANE) * _LANE)
    thw = min(thw, 32768)
    # Ensure >= ~4 total grid steps (B * HW-steps) when the spatial extent allows,
    # for pipeline overlap and megacore sharding.
    steps_needed = max(1, -(-4 // B))
    if steps_needed > 1 and HW >= steps_needed * 2 * _LANE:
        thw = min(thw, max(_LANE, _round_up(-(-HW // steps_needed), _LANE)))
    if thw >= HW:
        thw = HW  # block == full dim (legal even when HW % 128 != 0)

    grid = (B, pl.cdiv(HW, thw))
    w3 = weight.reshape(1, C, 1).astype(jnp.float32)
    b3 = bias.reshape(1, C, 1).astype(jnp.float32)

    # TODO(synk): very small C (< 8 f32 / < 16 bf16) leaves the cross-sublane reduce
    # on a mostly-padded vreg; real ConvNeXt uses C>=96, so no packing path here.
    out = pl.pallas_call(
        functools.partial(_ln_first_kernel, eps=eps),
        out_shape=jax.ShapeDtypeStruct((B, C, HW), x3.dtype),
        grid_spec=pltpu.PrefetchScalarGridSpec(
            num_scalar_prefetch=0,
            grid=grid,
            in_specs=[
                pl.BlockSpec((1, C, thw), lambda b, j: (b, 0, j)),
                pl.BlockSpec((1, C, 1), lambda b, j: (0, 0, 0)),
                pl.BlockSpec((1, C, 1), lambda b, j: (0, 0, 0)),
            ],
            out_specs=pl.BlockSpec((1, C, thw), lambda b, j: (b, 0, j)),
        ),
        compiler_params=pltpu.CompilerParams(
            dimension_semantics=("parallel", "parallel"),
            vmem_limit_bytes=_vmem_limit_bytes(C * thw, itemsize, soft_cap),
        ),
    )(x3, w3, b3)
    return out.reshape(B, C, H, W)


# ------------------------------- module port --------------------------------

class LayerNorm:
    """JAX/Pallas port of convnext_util.LayerNorm (channels_last / channels_first)."""

    def __init__(self, normalized_shape, eps=1e-6, data_format="channels_last"):
        if data_format not in ["channels_last", "channels_first"]:
            raise NotImplementedError
        self.weight = jnp.ones((normalized_shape,), dtype=jnp.float32)
        self.bias = jnp.zeros((normalized_shape,), dtype=jnp.float32)
        self.eps = eps
        self.data_format = data_format
        self.normalized_shape = (normalized_shape,)

    def __call__(self, x):
        C = self.normalized_shape[0]
        if self.data_format == "channels_last":
            orig_shape = x.shape
            x2d = x.reshape(-1, C)
            y = _layernorm_channels_last(x2d, self.weight, self.bias, self.eps)
            return y.reshape(orig_shape)
        else:
            assert x.shape[1] == C
            return _layernorm_channels_first(x, self.weight, self.bias, self.eps)


# --------------------------------- tests ------------------------------------

def _ref_channels_last(x, w, b, eps):
    x = x.astype(jnp.float32)
    mean = jnp.mean(x, axis=-1, keepdims=True)
    var = jnp.mean((x - mean) ** 2, axis=-1, keepdims=True)
    return (x - mean) / jnp.sqrt(var + eps) * w + b


def _ref_channels_first(x, w, b, eps):
    x = x.astype(jnp.float32)
    u = jnp.mean(x, axis=1, keepdims=True)
    s = jnp.mean((x - u) ** 2, axis=1, keepdims=True)
    xn = (x - u) / jnp.sqrt(s + eps)
    return w[None, :, None, None] * xn + b[None, :, None, None]


if __name__ == "__main__":
    key = jax.random.PRNGKey(0)
    k1, k2, k3 = jax.random.split(key, 3)

    # ---- channels_first: NCHW input (B=2, C=4, H=16, W=16), transpose-free ----
    x_cf = jax.random.normal(k1, (2, 4, 16, 16), dtype=jnp.float32)
    ln_cf = LayerNorm(4, eps=1e-6, data_format="channels_first")
    ln_cf.weight = jnp.linspace(0.5, 1.5, 4, dtype=jnp.float32)
    ln_cf.bias = jnp.linspace(-0.2, 0.2, 4, dtype=jnp.float32)
    y_cf = jax.block_until_ready(ln_cf(x_cf))
    ref_cf = _ref_channels_first(x_cf, ln_cf.weight, ln_cf.bias, ln_cf.eps)
    assert y_cf.shape == (2, 4, 16, 16)
    assert jnp.max(jnp.abs(y_cf - ref_cf)) < 1e-4

    # ---- channels_last: (B=2, H=8, W=8, C=32) ----
    x_cl = jax.random.normal(k2, (2, 8, 8, 32), dtype=jnp.float32)
    ln_cl = LayerNorm(32, eps=1e-6, data_format="channels_last")
    ln_cl.weight = 1.0 + 0.01 * jnp.arange(32, dtype=jnp.float32)
    ln_cl.bias = 0.005 * jnp.arange(32, dtype=jnp.float32)
    y_cl = jax.block_until_ready(ln_cl(x_cl))
    ref_cl = _ref_channels_last(x_cl, ln_cl.weight, ln_cl.bias, ln_cl.eps)
    assert y_cl.shape == (2, 8, 8, 32)
    assert jnp.max(jnp.abs(y_cl - ref_cl)) < 1e-4

    # ---- channels_last bf16 epilogue path (same small shape) ----
    y_bf = jax.block_until_ready(ln_cl(x_cl.astype(jnp.bfloat16)))
    assert y_bf.dtype == jnp.bfloat16
    assert jnp.max(jnp.abs(y_bf.astype(jnp.float32) - ref_cl)) < 1.2e-1

    # ---- channels_last, ConvNeXt-ish dims: multi-step grid + ragged last block ----
    x_big = jax.random.normal(k3, (4, 40, 40, 96), dtype=jnp.float32)
    ln_big = LayerNorm(96, eps=1e-6, data_format="channels_last")
    ln_big.weight = 1.0 + 0.001 * jnp.arange(96, dtype=jnp.float32)
    ln_big.bias = 0.002 * jnp.arange(96, dtype=jnp.float32)
    y_big = jax.block_until_ready(ln_big(x_big))
    ref_big = _ref_channels_last(x_big, ln_big.weight, ln_big.bias, ln_big.eps)
    assert y_big.shape == (4, 40, 40, 96)
    assert jnp.max(jnp.abs(y_big - ref_big)) < 1e-4

    print("KERNEL_OK")
</pallas_src>

<mosaic_0001>
module attributes {stable_mosaic.version = 11 : i64} {
  func.func @_ln_first_kernel(%arg0: i32, %arg1: i32, %arg2: memref<1x4x256xf32, #tpu.memory_space<vmem>>, %arg3: memref<1x4x1xf32, #tpu.memory_space<vmem>>, %arg4: memref<1x4x1xf32, #tpu.memory_space<vmem>>, %arg5: memref<1x4x256xf32, #tpu.memory_space<vmem>>) attributes {dimension_semantics = [#tpu.dimension_semantics<parallel>, #tpu.dimension_semantics<parallel>], iteration_bounds = array<i64: 2, 1>, scalar_prefetch = 0 : i64, scratch_operands = 0 : i64, tpu.core_type = #tpu.core_type<tc>, window_params = [{transform_indices = @transform_0, window_bounds = array<i64: 1, 4, 256>}, {pipeline_mode = #tpu.pipeline_mode<synchronous>, transform_indices = @transform_1, window_bounds = array<i64: 1, 4, 1>}, {pipeline_mode = #tpu.pipeline_mode<synchronous>, transform_indices = @transform_2, window_bounds = array<i64: 1, 4, 1>}, {transform_indices = @transform_3, window_bounds = array<i64: 1, 4, 256>}]} {
    %c0 = arith.constant 0 : index
    %c0_0 = arith.constant 0 : index
    %c0_1 = arith.constant 0 : index
    %0 = vector.load %arg2[%c0, %c0_0, %c0_1] : memref<1x4x256xf32, #tpu.memory_space<vmem>>, vector<1x4x256xf32>
    %cst = arith.constant dense<0.000000e+00> : vector<1x256xf32>
    %1 = vector.multi_reduction <add>, %0, %cst [1] : vector<1x4x256xf32> to vector<1x256xf32>
    %2 = vector.shape_cast %1 : vector<1x256xf32> to vector<1x1x256xf32>
    %cst_2 = arith.constant 4.000000e+00 : f32
    %3 = vector.broadcast %cst_2 : f32 to vector<1x1x256xf32>
    %4 = arith.divf %2, %3 : vector<1x1x256xf32>
    %5 = vector.broadcast %4 : vector<1x1x256xf32> to vector<1x4x256xf32>
    %6 = arith.subf %0, %5 : vector<1x4x256xf32>
    %7 = arith.mulf %6, %6 : vector<1x4x256xf32>
    %cst_3 = arith.constant dense<0.000000e+00> : vector<1x256xf32>
    %8 = vector.multi_reduction <add>, %7, %cst_3 [1] : vector<1x4x256xf32> to vector<1x256xf32>
    %9 = vector.shape_cast %8 : vector<1x256xf32> to vector<1x1x256xf32>
    %cst_4 = arith.constant 4.000000e+00 : f32
    %10 = vector.broadcast %cst_4 : f32 to vector<1x1x256xf32>
    %11 = arith.divf %9, %10 : vector<1x1x256xf32>
    %cst_5 = arith.constant 9.99999997E-7 : f32
    %12 = vector.broadcast %cst_5 : f32 to vector<1x1x256xf32>
    %13 = arith.addf %11, %12 : vector<1x1x256xf32>
    %14 = math.rsqrt %13 : vector<1x1x256xf32>
    %15 = vector.broadcast %14 : vector<1x1x256xf32> to vector<1x4x256xf32>
    %16 = arith.mulf %6, %15 : vector<1x4x256xf32>
    %c0_6 = arith.constant 0 : index
    %c0_7 = arith.constant 0 : index
    %c0_8 = arith.constant 0 : index
    %17 = vector.load %arg3[%c0_6, %c0_7, %c0_8] : memref<1x4x1xf32, #tpu.memory_space<vmem>>, vector<1x4x1xf32>
    %18 = vector.broadcast %17 : vector<1x4x1xf32> to vector<1x4x256xf32>
    %19 = arith.mulf %16, %18 : vector<1x4x256xf32>
    %c0_9 = arith.constant 0 : index
    %c0_10 = arith.constant 0 : index
    %c0_11 = arith.constant 0 : index
    %20 = vector.load %arg4[%c0_9, %c0_10, %c0_11] : memref<1x4x1xf32, #tpu.memory_space<vmem>>, vector<1x4x1xf32>
    %21 = vector.broadcast %20 : vector<1x4x1xf32> to vector<1x4x256xf32>
    %22 = arith.addf %19, %21 : vector<1x4x256xf32>
    %c0_12 = arith.constant 0 : index
    %c0_13 = arith.constant 0 : index
    %c0_14 = arith.constant 0 : index
    %23 = vector.load %arg5[%c0_12, %c0_13, %c0_14] : memref<1x4x256xf32, #tpu.memory_space<vmem>>, vector<1x4x256xf32>
    tpu.vector_store %arg5[%c0_12, %c0_13, %c0_14], %22 {strides = array<i32>} : memref<1x4x256xf32, #tpu.memory_space<vmem>>, vector<1x4x256xf32>,
    return
  }
  func.func @transform_0(%arg0: i32, %arg1: i32) -> (i32, i32, i32) {
    %c0_i32 = arith.constant 0 : i32
    %c0_i32_0 = arith.constant 0 : i32
    return %arg0, %c0_i32, %arg1 : i32, i32, i32
  }
  func.func @transform_1(%arg0: i32, %arg1: i32) -> (i32, i32, i32) {
    %c0_i32 = arith.constant 0 : i32
    %c0_i32_0 = arith.constant 0 : i32
    %c0_i32_1 = arith.constant 0 : i32
    %c0_i32_2 = arith.constant 0 : i32
    return %c0_i32, %c0_i32_0, %c0_i32_1 : i32, i32, i32
  }
  func.func @transform_2(%arg0: i32, %arg1: i32) -> (i32, i32, i32) {
    %c0_i32 = arith.constant 0 : i32
    %c0_i32_0 = arith.constant 0 : i32
    %c0_i32_1 = arith.constant 0 : i32
    %c0_i32_2 = arith.constant 0 : i32
    return %c0_i32, %c0_i32_0, %c0_i32_1 : i32, i32, i32
  }
  func.func @transform_3(%arg0: i32, %arg1: i32) -> (i32, i32, i32) {
    %c0_i32 = arith.constant 0 : i32
    %c0_i32_0 = arith.constant 0 : i32
    return %arg0, %c0_i32, %arg1 : i32, i32, i32
  }
}

</mosaic_0001>

<bundles_post_ra>
// kernel: tpu_custom_call.1
= control target key start
LH: loop header
LB: loop body
LE: loop exit
PB: predicated region body
PF: predicated region fallthrough
CT: control target
= control target key end

     0   :  { %8 = vsyncpa [#allocation3], 0  ;;  %s804_s0 = inlined_call_operand.hbm [shape: f32[2,4,256], index: 0, kind: input, shape index: {}]   ;;  %s805_s1 = inlined_call_operand.vmem [shape: f32[1,4,1], index: 1, kind: input, shape index: {}]   ;;  %s806_s2 = inlined_call_operand.vmem [shape: f32[1,4,1], index: 2, kind: input, shape index: {}]   ;;  %s807_s3 = inlined_call_operand.hbm [shape: f32[2,4,256], index: 3, kind: output, shape index: {}]  }
   0x1   :  { %10 = vsyncpa [#allocation3 + $0x1], 0 }
   0x2   :  { %11 = vsyncpa [#allocation4], 0 }
   0x3   :  { %13 = vsyncpa [#allocation4 + $0x1], 0  ;;  %s618_s12 = smov 0   ;;  %s620_s13 = smov 0  }
   0x4   :  { %s622_s14 = smov 0   ;;  %s624_s15 = smov 0  }
   0x5   :  { %s626_s16 = smov 0   ;;  %s628_s17 = smov 0  }
   0x6 LB: > { %s393_s18 = sadd.s32 4294967295, %s592_s17   ;;  %s394_s19 = sadd.s32 4294967294, %s592_s17   ;;  %s592_s17 = sphi %s628_s17, %s19_s17   ;;  %s588_s16 = sphi %s626_s16, %s823_s16   ;;  %s584_s15 = sphi %s624_s15, %s822_s15   ;;  %s580_s14 = sphi %s622_s14, %s821_s14   ;;  %s576_s13 = sphi %s620_s13, %s820_s13   ;;  %s572_s12 = sphi %s618_s12, %s819_s12  }
   0x7   : > { %s31_s20 = sadd.s32 1, %s588_s16  ;;  %s40_s21 = sadd.s32 1, %s580_s14 }
   0x8   : > { %p33_p0 = scmp.ge.s32.totalorder %s31_s20, 2  ;;  %p47_p1 = scmp.ne.s32.totalorder %s580_s14, %s576_s13 }
   0x9   : > { %p48_p2 = scmp.eq.s32.totalorder %s592_s17, 0  ;;  %p53_p3 = scmp.ne.s32.totalorder %s576_s13, %s572_s12 }
   0xa   : > { %s825_s20 = smov (%p33_p0, %s31_s20), 0  ;;  %p54_p5 = scmp.eq.s32.totalorder %s393_s18, 0 }
   0xb   : > { %p659_p4 = por %p48_p2, %p47_p1  ;;  %s35_s23 = ssub.s32 %s588_s16, %s825_s20 }
   0xc   : > { %p121_p6 = scmp.eq.s32.totalorder %s393_s18, 1  ;;  %p38_p7 = scmp.eq.s32.totalorder %s35_s23, 0 }
   0xd   : > { %p665_p8 = por %p54_p5, %p53_p3  ;;  %p127_p10 = scmp.eq.s32.totalorder %s394_s19, 1 }
   0xe   : > { %p669_p9 = por %p121_p6, %p47_p1  ;;  %p422_p13 = scmp.lt.s32.totalorder %s592_s17, 2 }
   0xf   : > { %s674_s26 = scalar_select %p38_p7, %s580_s14, %s40_s21  }
  0x10   : > { %s811_s25 = scalar_select %p669_p9, 1, 0 }
  0x11   : > { %p676_p11 = por %p127_p10, %p53_p3  ;;  %s153_s28 = sand.u32 1, %s580_s14  }
  0x12   : > { %s397_s29 = sshll.u32 %s153_s28, 3  ;;  %s408_s30 = sshll.u32 %s588_s16, 7 }
  0x13   : > { %s812_s27 = scalar_select %p676_p11, 1, 0 }
  0x14   : > { %s687_s6 = scalar_lea.hbm %s804_s0, %s408_s30  ;;  %s157_s7 = scalar_lea.vmem [#allocation2], %s397_s29 }
  0x15   : > { %s167_s8 = sshll.u32 %s157_s7, 4  ;;  %p693_p0 = pnand %p422_p13, %p659_p4  ;;  %s689_s8 = int_to_ptr.vmem [resolvable:$true] %s167_s8 }
  0x16   : > { %s154_s10 = scalar_lea.sflag [#allocation3], %s153_s28  ;;  %s480_s11 = scalar_lea.hbm %s687_s6, 128 }
  0x17   : > { %p481_p3 = scmp.ne.s32.totalorder %s687_s6, %s480_s11  ;;  %p482_p5 = pneg %p693_p0 }
  0x18   : > { %s485_s21 = scalar_lea.hbm %s804_s0, 256  ;;  %p486_p4 = scmp.lt.u32.totalorder %s687_s6, %s804_s0 }
  0x19   : > { %p483_p6 = pnand %p482_p5, %p481_p3  ;;  %p487_p10 = scmp.lt.u32.totalorder %s485_s21, %s480_s11 }
  0x1a   : > { %p489_p12 = scmp.lt.u32.totalorder %s480_s11, %s687_s6 }
  0x1b   : > { %p484_p7 = pneg %p483_p6  ;;  %p488_p13 = por %p487_p10, %p486_p4 }
  0x1d   : > { %p490_p1 = por %p489_p12, %p488_p13 }
  0x1f   : > { %p491_p2 = pnand %p490_p1, %p484_p7 }
  0x21   : > { %494 = shalt.err (!%p491_p2)
}
  0x22   : > { %s495_s28 = scalar_lea.vmem %s689_s8, 128  ;;  %s594_s29 = smov [#allocation2]  }
  0x23   : > { %p496_p3 = scmp.ne.s32.totalorder %s689_s8, %s495_s28  ;;  %s500_s30 = sshll.u32 %s594_s29, 4  ;;  %s501_s30 = int_to_ptr.vmem [resolvable:$false] %s500_s30 }
  0x24   : > { %s502_s4 = scalar_lea.vmem %s501_s30, 256  ;;  %p503_p9 = scmp.lt.s32.totalorder %s689_s8, %s501_s30 }
  0x25   : > { %p498_p6 = pnand %p496_p3, %p482_p5  ;;  %p504_p4 = scmp.lt.s32.totalorder %s502_s4, %s495_s28 }
  0x27   : > { %p499_p11 = pneg %p498_p6  ;;  %p505_p10 = por %p504_p4, %p503_p9 }
  0x29   : > { %p506_p12 = pnand %p505_p10, %p499_p11 }
  0x2b   : > { %509 = shalt.err (!%p506_p12)
}
  0x2c   : > { %417 = dma.hbm_to_vmem [thread:$0]  (!%p693_p0), %s687_s6, 128, %s689_s8, %s154_s10  }
  0x2d   : > { %p814_p1 = scmp.lt.s32.totalorder %s592_s17, 3  ;;  %p815_p2 = scmp.ge.s32.totalorder %s592_s17, 1 }
  0x2f   : > { %p173_p5 = pnand %p815_p2, %p814_p1 }
  0x30   : > { %s729_s5 = sand.u32 (!%p173_p5), 1, %s576_s13  }
  0x31   : > { %176 = sbr.rel (%p173_p5) target bundleno = 209 (0xd1), region = 32  ;;  %s401_s7 = sshll.u32 (!%p173_p5), %s729_s5, 3 }
  0x32   : > { %s179_s11 = scalar_lea.sflag (!%p173_p5), [#allocation3], %s729_s5  ;;  %s182_s9 = scalar_lea.vmem (!%p173_p5), [#allocation2], %s401_s7 }
  0x38   : > { %563 = dma.done.wait (%p665_p8), %s179_s11, 128  }
  0x39   : > { %565 = vsyncadd (%p665_p8), %s179_s11, 4294967168  ;;  %v595_v0 = vmov 0   ;;  %v263_v1 = vld [vmem:[%s805_s1] sm:$0xf]  ;;  %vm211_vm0 = vcmask 1043456   ;;  %v271_v45 = vlaneseq  ;;  %s409_s24 = sshll.u32 %s584_s15, 7 }
  0x3a   : > { %474 = vset.pattern.permute.xlu0 %v595_v0  ;;  %v277_v2 = vld [vmem:[%s806_s2] sm:$0xf]  ;;  %v596_v43 = vmov 839922192   ;;  %s204_s19 = scalar_lea.vmem [#allocation5], %s401_s7  ;;  %s755_s28 = scalar_lea.hbm %s807_s3, %s409_s24 }
  0x3b   : > { %266 = vperm.xlu0 %474, %v263_v1   ;;  %v207_v3 = vld [vmem:[%s182_s9] sm:$0xff]  ;;  %v269_v44 = vunpack.c.l.s4 %v596_v43  ;;  %v272_v48 = vshrl.u32 %v271_v45, 7  ;;  %s309_s21 = sshll.u32 %s204_s19, 4  ;;  %s293_s29 = scalar_lea.sflag [#allocation4], %s729_s5  ;;  %s757_s21 = int_to_ptr.vmem [resolvable:$true] %s309_s21 }
  0x3c   : > { %v209_v4 = vcombine.high %v207_v3, %v207_v3  ;;  %v212_v5 = vsel %vm211_vm0, %v207_v3, 0.0  ;;  %s510_s30 = scalar_lea.vmem %s757_s21, 128  ;;  %p816_p9 = scmp.ne.s32.totalorder %s811_s25, 0 }
  0x3d   : > { %v213_v7 = vrot.slane %v212_v5, 4  ;;  %v270_v47 = vunpack.c.0.s8 %v269_v44  ;;  %p511_p8 = scmp.ne.s32.totalorder %s757_s21, %s510_s30  ;;  %s597_s15 = smov [#allocation5]  }
  0x3e   : > { %v219_v6 = vsel %vm211_vm0, %v209_v4, 0.0  ;;  %s514_s4 = sshll.u32 %s597_s15, 4  ;;  %s515_s4 = int_to_ptr.vmem [resolvable:$false] %s514_s4 }
  0x3f   : > { %280 = vperm.xlu0 %474, %v277_v2   ;;  %v220_v8 = vrot.slane %v219_v6, 4  ;;  %v214_v9 = vadd.f32 %v213_v7, %v212_v5  ;;  %v273_v50 = vsub.s32 %v270_v47, %v272_v48  ;;  %p512_p11 = pnand %p511_p8, %p816_p9  ;;  %s516_s7 = scalar_lea.vmem %s515_s4, 256 }
  0x40   : > { %p517_p7 = scmp.lt.s32.totalorder %s757_s21, %s515_s4  ;;  %p518_p13 = scmp.lt.s32.totalorder %s516_s7, %s510_s30 }
  0x41   : > { %v221_v10 = vadd.f32 %v220_v8, %v219_v6  ;;  %v215_v11 = vrot.slane %v214_v9, 2  ;;  %p513_p0 = pneg %p512_p11 }
  0x42   : > { %p519_p3 = por %p518_p13, %p517_p7 }
  0x43   : > { %v222_v12 = vrot.slane %v221_v10, 2  ;;  %v216_v13 = vadd.f32 %v215_v11, %v214_v9 }
  0x44   : > { %p520_p6 = pnand %p519_p3, %p513_p0 }
  0x45   : > { %v223_v14 = vadd.f32 %v222_v12, %v221_v10  ;;  %v217_v15 = vrot.slane %v216_v13, 1 }
  0x47   : > { %v224_v16 = vrot.slane %v223_v14, 1  ;;  %v218_v17 = vadd.f32 %v217_v15, %v216_v13 }
  0x49   : > { %v225_v18 = vadd.f32 %v224_v16, %v223_v14  ;;  %v227_v19 = vmul.f32 0.25, %v218_v17 }
  0x4b   : > { %v228_v20 = vmul.f32 0.25, %v225_v18 }
  0x4d   : > { %v231_v21 = vcombine.low %v227_v19, %v228_v20 }
  0x4f   : > { %v233_v22 = vsub.f32 %v207_v3, %v231_v21 }
  0x51   : > { %v234_v23 = vmul.f32 %v233_v22, %v233_v22 }
  0x53   : > { %v236_v24 = vcombine.high %v234_v23, %v234_v23  ;;  %v238_v25 = vsel %vm211_vm0, %v234_v23, 0.0 }
  0x54   : > { %v239_v27 = vrot.slane %v238_v25, 4 }
  0x55   : > { %v245_v26 = vsel %vm211_vm0, %v236_v24, 0.0 }
  0x56   : > { %v246_v28 = vrot.slane %v245_v26, 4  ;;  %v240_v29 = vadd.f32 %v239_v27, %v238_v25 }
  0x58   : > { %v247_v30 = vadd.f32 %v246_v28, %v245_v26  ;;  %v241_v31 = vrot.slane %v240_v29, 2 }
  0x5a   : > { %v248_v32 = vrot.slane %v247_v30, 2  ;;  %v242_v33 = vadd.f32 %v241_v31, %v240_v29 }
  0x5c   : > { %v249_v34 = vadd.f32 %v248_v32, %v247_v30  ;;  %v243_v35 = vrot.slane %v242_v33, 1 }
  0x5e   : > { %v250_v36 = vrot.slane %v249_v34, 1  ;;  %v244_v37 = vadd.f32 %v243_v35, %v242_v33 }
  0x60   : > { %v251_v38 = vadd.f32 %v250_v36, %v249_v34  ;;  %v252_v39 = vmul.f32 0.25, %v244_v37 }
  0x62   : > { %v253_v40 = vmul.f32 0.25, %v251_v38  ;;  %v254_v41 = vadd.f32 1e-06, %v252_v39 }
  0x64   : > { %v255_v42 = vadd.f32 1e-06, %v253_v40  ;;  %476 = vrsqrt.f32 %v254_v41 }
  0x66   : > { %478 = vrsqrt.f32 %v255_v42 }
  0x6e   : > { %v477_v46 = vpop.eup %476 }
  0x70   : > { %v479_v49 = vpop.eup %478 }
  0x71   : > { %v260_v51 = vcombine.low %v477_v46, %v479_v49 }
  0x73   : > { %v262_v53 = vmul.f32 %v260_v51, %v233_v22 }
  0xba   : > { %v267_v52 = vpop.permute.xlu0 %266 }
  0xbb   : > { %v274_v54 = vrot.slane %v267_v52, %v273_v50 }
  0xbd   : > { %v276_v56 = vmul.f32 %v274_v54, %v262_v53 }
  0xbe   : > { %v281_v55 = vpop.permute.xlu0 %280 }
  0xbf   : > { %v288_v57 = vrot.slane %v281_v55, %v273_v50 }
  0xc1   : > { %v290_v58 = vadd.f32 %v288_v57, %v276_v56 }
  0xc3   : > { %291 = vst [vmem:[%s204_s19] sm:$0xff] %v290_v58 }
  0xc4   : > { %523 = shalt.err (!%p520_p6)
}
  0xc5   : > { %s524_s5 = scalar_lea.hbm %s755_s28, 128  ;;  %s528_s6 = scalar_lea.hbm %s807_s3, 256 }
  0xc6   : > { %p525_p4 = scmp.ne.s32.totalorder %s755_s28, %s524_s5  ;;  %p529_p1 = scmp.lt.u32.totalorder %s755_s28, %s807_s3 }
  0xc7   : > { %p530_p2 = scmp.lt.u32.totalorder %s528_s6, %s524_s5  ;;  %p532_p8 = scmp.lt.u32.totalorder %s524_s5, %s755_s28 }
  0xc8   : > { %p526_p10 = pnand %p525_p4, %p816_p9 }
  0xc9   : > { %p531_p5 = por %p530_p2, %p529_p1 }
  0xca   : > { %p527_p12 = pneg %p526_p10 }
  0xcb   : > { %p533_p11 = por %p532_p8, %p531_p5 }
  0xcd   : > { %p534_p0 = pnand %p533_p11, %p527_p12 }
  0xcf   : > { %537 = shalt.err (!%p534_p0)
}
  0xd0   : > { %412 = dma.vmem_to_hbm [thread:$0]  (%p816_p9), %s757_s21, 128, %s755_s28, %s293_s29  }
  0xd1 PF: > { %s321_s18 = sand.u32 1, %s572_s12   ;;  %p817_p7 = scmp.ne.s32.totalorder %s812_s27, 0 }
  0xd2   : > { %p818_p13 = scmp.ge.s32.totalorder %s592_s17, 2  ;;  %s322_s24 = scalar_lea.sflag [#allocation4], %s321_s18 }
  0xd4   : > { %p419_p3 = pnand %p818_p13, %p817_p7 }
  0xd6   : > { %567 = dma.done.wait (!%p419_p3), %s322_s24, 128  }
  0xd7   : > { %569 = vsyncadd (!%p419_p3), %s322_s24, 4294967168  ;;  %s19_s17 = sadd.s32 1, %s592_s17   ;;  %s819_s12 = smov %s576_s13 }
  0xd8   : > { %p16_p6 = scmp.ge.s32.totalorder %s19_s17, 4   ;;  %s820_s13 = smov %s580_s14 }
  0xd9   : > { %s821_s14 = smov %s674_s26  ;;  %s822_s15 = smov %s588_s16 }
  0xda   : > { %s823_s16 = smov %s825_s20  ;;  %18 = sbr.rel (!%p16_p6) target bundleno = 6 (0x6), region = 77 }
  0xe1   :  { %327 = vsyncpa [#allocation3], 1 }
  0xe2   :  { %329 = vsyncpa [#allocation3 + $0x1], 1 }
  0xe3   :  { %330 = vsyncpa [#allocation4], 1 }
  0xe4   :  { %332 = vsyncpa [#allocation4 + $0x1], 1 }

</bundles_post_ra>
